<compile_context>
chip_gen: v5e
topology: v5e:2x2
jax: 0.10.0
libtpu: 0.0.40
codegen_flags: <defaults>
</compile_context>

<pallas_src>
import jax
import jax.numpy as jnp
from jax.experimental import pallas as pl
from jax.experimental.pallas import tpu as pltpu


def _identity_kernel(x_ref, o_ref):
    # Pure pass-through: copy the current VMEM tile.
    o_ref[...] = x_ref[...]


def _sublane_pack(dtype) -> int:
    """Rows per packed sublane group: 8 for 4-byte, 16 for 2-byte, 32 for 1-byte dtypes."""
    itemsize = jnp.dtype(dtype).itemsize
    return max(8, 32 // max(1, itemsize))


def _pick_layout(total: int, pack: int):
    """Choose (rows, cols, pad) with cols a multiple of 128 (lane-dense) and,
    when possible, rows >= the sublane packing so vregs are fully filled."""
    for cand in (2048, 1024, 512, 256, 128):
        if total % cand == 0 and total // cand >= pack:
            return total // cand, cand, 0
    if total % 128 == 0:
        # Small tensor: lane-dense but sublane-light; still a single cheap block.
        return total // 128, 128, 0
    # Awkward (e.g. prime) sizes: pad up to the next multiple of 128 so the
    # whole copy stays lane-dense; masking cost is confined to the padded tail.
    padded = pl.cdiv(total, 128) * 128
    return padded // 128, 128, padded - total


def identity_forward(x):
    """Identity forward: returns x unchanged (via a lane/sublane-dense Pallas copy)."""
    orig_shape = x.shape
    total = int(x.size)
    if total == 0:
        return x  # nothing to copy

    pack = _sublane_pack(x.dtype)
    rows, cols, pad = _pick_layout(total, pack)

    flat = x.reshape(-1)
    if pad:
        flat = jnp.pad(flat, (0, pad))
    flat = flat.reshape(rows, cols)

    itemsize = jnp.dtype(x.dtype).itemsize
    bytes_per_row = cols * itemsize
    total_bytes = rows * bytes_per_row

    # ~2 MiB tiles: with double-buffered input + output that is ~8 MiB resident
    # VMEM, safe under every generation's scoped-VMEM default (v5e 16 MiB,
    # v6e/v7x 32 MiB) while amortizing the ~0.35 us per-grid-step overhead.
    target_tile_bytes = 2 << 20
    tile_r = max(1, min(rows, target_tile_bytes // bytes_per_row))
    if tile_r >= pack:
        tile_r = (tile_r // pack) * pack  # dtype-aware sublane alignment

    # v7x megacore: for mid/large tensors make sure there are >= 2 grid steps
    # so both TensorCores get a share of the streaming copy.
    if total_bytes > (4 << 20) and tile_r >= rows and rows > pack:
        tile_r = max(pack, ((rows // 2) // pack) * pack)

    tile_r = max(1, min(tile_r, rows))
    grid = (pl.cdiv(rows, tile_r),)

    out = pl.pallas_call(
        _identity_kernel,
        out_shape=jax.ShapeDtypeStruct((rows, cols), flat.dtype),
        grid_spec=pl.GridSpec(
            grid=grid,
            in_specs=[pl.BlockSpec((tile_r, cols), lambda i: (i, 0))],
            out_specs=pl.BlockSpec((tile_r, cols), lambda i: (i, 0)),
        ),
        # No input_output_aliases: x stays live at the call site, so aliasing
        # would trigger a defensive XLA copy and double HBM traffic.
        compiler_params=pltpu.CompilerParams(
            dimension_semantics=("parallel",)),
    )(flat)

    out = out.reshape(-1)
    if pad:
        out = out[:total]
    return out.reshape(orig_shape)


class Identity:
    """JAX/Pallas equivalent of the PyTorch Identity module.

    The PyTorch __init__ takes (in_channels, out_channels) but allocates no
    parameters, so there is nothing to initialize here.
    """

    def __init__(self, in_channels: int, out_channels: int):
        del in_channels, out_channels  # no parameters

    def __call__(self, x):
        return identity_forward(x)


if __name__ == "__main__":
    key = jax.random.PRNGKey(0)
    # NCHW input, small shapes: batch=2, channels=4, spatial=16x16.
    x = jax.random.normal(key, (2, 4, 16, 16), dtype=jnp.float32)

    mod = Identity(in_channels=4, out_channels=4)
    y = mod(x)
    y = jax.block_until_ready(y)

    assert y.shape == x.shape and y.dtype == x.dtype
    assert bool(jnp.array_equal(y, x))
    print("KERNEL_OK")
</pallas_src>

<mosaic_0001>
module attributes {stable_mosaic.version = 11 : i64} {
  func.func @_identity_kernel(%arg0: i32, %arg1: memref<8x256xf32, #tpu.memory_space<vmem>>, %arg2: memref<8x256xf32, #tpu.memory_space<vmem>>) attributes {dimension_semantics = [#tpu.dimension_semantics<parallel>], iteration_bounds = array<i64: 1>, scalar_prefetch = 0 : i64, scratch_operands = 0 : i64, tpu.core_type = #tpu.core_type<tc>, window_params = [{transform_indices = @transform_0, window_bounds = array<i64: 8, 256>}, {transform_indices = @transform_1, window_bounds = array<i64: 8, 256>}]} {
    %c0 = arith.constant 0 : index
    %c0_0 = arith.constant 0 : index
    %0 = vector.load %arg1[%c0, %c0_0] : memref<8x256xf32, #tpu.memory_space<vmem>>, vector<8x256xf32>
    %c0_1 = arith.constant 0 : index
    %c0_2 = arith.constant 0 : index
    %1 = vector.load %arg2[%c0_1, %c0_2] : memref<8x256xf32, #tpu.memory_space<vmem>>, vector<8x256xf32>
    tpu.vector_store %arg2[%c0_1, %c0_2], %0 {strides = array<i32>} : memref<8x256xf32, #tpu.memory_space<vmem>>, vector<8x256xf32>,
    return
  }
  func.func @transform_0(%arg0: i32) -> (i32, i32) {
    %c0_i32 = arith.constant 0 : i32
    %c0_i32_0 = arith.constant 0 : i32
    return %arg0, %c0_i32 : i32, i32
  }
  func.func @transform_1(%arg0: i32) -> (i32, i32) {
    %c0_i32 = arith.constant 0 : i32
    %c0_i32_0 = arith.constant 0 : i32
    return %arg0, %c0_i32 : i32, i32
  }
}

</mosaic_0001>

<bundles_post_ra>
// kernel: tpu_custom_call.1
= control target key start
LH: loop header
LB: loop body
LE: loop exit
PB: predicated region body
PF: predicated region fallthrough
CT: control target
= control target key end

     0   :  { %6 = vsyncpa [#allocation3], 0  ;;  %s116_s0 = inlined_call_operand.hbm [shape: f32[8,256], index: 0, kind: input, shape index: {}]   ;;  %s117_s1 = inlined_call_operand.hbm [shape: f32[8,256], index: 1, kind: output, shape index: {}]  }
   0x1   :  { %7 = vsyncpa [#allocation4], 0  ;;  %s13_s8 = sshll.u32 %s116_s0, 4  ;;  %s98_s9 = smov [#allocation2]   ;;  %s14_s8 = int_to_ptr.hbm [resolvable:$true] %s13_s8 }
   0x2   :  { %s15_s10 = sshll.u32 %s98_s9, 4  ;;  %s16_s10 = int_to_ptr.vmem [resolvable:$true] %s15_s10 }
   0x3   :  { %18 = dma.hbm_to_vmem [thread:$0]  %s14_s8, 256, %s16_s10, [#allocation3]  }
   0x4   :  { %94 = dma.done.wait [#allocation3], 256  }
   0x5   :  { %95 = vsyncadd [#allocation3], 4294967040  ;;  %s99_s11 = smov [#allocation5]   ;;  %s34_s15 = sshll.u32 %s117_s1, 4  ;;  %v23_v0 = vld [vmem:[#allocation2] sm:$0xff]  ;;  %v24_v1 = vld [vmem:[#allocation2 + $0x8] sm:$0xff]  ;;  %s35_s15 = int_to_ptr.hbm [resolvable:$true] %s34_s15 }
   0x6   :  { %s32_s12 = sshll.u32 %s99_s11, 4  ;;  %25 = vst [vmem:[#allocation5] sm:$0xff] %v23_v0  ;;  %s33_s12 = int_to_ptr.vmem [resolvable:$true] %s32_s12 }
   0x7   :  { %26 = vst [vmem:[#allocation5 + $0x8] sm:$0xff] %v24_v1 }
   0x8   :  { %37 = dma.vmem_to_hbm [thread:$0]  %s33_s12, 256, %s35_s15, [#allocation4]  }
   0x9   :  { %96 = dma.done.wait [#allocation4], 256  }
   0xa   :  { %97 = vsyncadd [#allocation4], 4294967040 }
   0xb   :  { %42 = vsyncpa [#allocation3], 1 }
   0xc   :  { %43 = vsyncpa [#allocation4], 1 }

</bundles_post_ra>
